<compile_context>
chip_gen: v6e
topology: v6e:2x2x1
jax: 0.10.0
libtpu: 0.0.40
codegen_flags: <defaults>
</compile_context>

<pallas_src>
import functools

import jax
import jax.numpy as jnp
from jax.experimental import pallas as pl
from jax.experimental.pallas import tpu as pltpu


def _round_up(x, m):
    return (x + m - 1) // m * m


def _pick_tile_defaults():
    """Per-generation tile defaults: (tm, tn, tk_max)."""
    try:
        kind = jax.devices()[0].device_kind.lower()
    except Exception:
        kind = ""
    if "v4" in kind or "v5" in kind:
        # 128x128-native MXU; exploit large (128 MiB) VMEM with bigger M/K tiles.
        return 512, 128, 2048
    # v6e / v7x: 256x256 MXU.
    return 256, 256, 512


def _conv_gemm_kernel(p_ref, w_ref, b_ref, o_ref, *, tk, resident_w):
    # p_ref : (tm, TK)            im2col patch tile (compute dtype, lane-dense)
    # w_ref : (Kp, tn) or (TK,tn) weight (compute dtype); resident if (Kp, tn)
    # b_ref : (1, tn)             bias (f32)
    # o_ref : (tm, tn)            f32 output tile == accumulator (resident over k)
    k = pl.program_id(2)

    if resident_w:
        ks = pl.multiple_of(k * tk, tk)          # tk is a multiple of 128
        w = w_ref[pl.ds(ks, tk), :]              # sublane-dim slice only
    else:
        w = w_ref[...]

    part = jnp.dot(p_ref[...], w, preferred_element_type=jnp.float32)

    @pl.when(k == 0)
    def _():
        o_ref[...] = b_ref[...] + part           # bias folded into first k-step

    @pl.when(k > 0)
    def _():
        o_ref[...] += part


@functools.partial(
    jax.jit, static_argnames=("stride", "compute_dtype", "tm", "tn", "tk_max"))
def conv_forward(x_nchw, weight, bias, *, stride=1,
                 compute_dtype=jnp.bfloat16, tm=None, tn=None, tk_max=None):
    """Equivalent of Conv(nIn, nOut, kSize, stride).forward(x).

    x_nchw : (N, Cin, H, W)    float32
    weight : (Cout, Cin, K, K) float32 (PyTorch OIHW layout)
    bias   : (Cout,)           float32
    returns: (N, Cout, Ho, Wo) x.dtype
    """
    N, Cin, H, W = x_nchw.shape
    Cout, _, K, _ = weight.shape
    pad = (K - 1) // 2                      # matches int((kSize - 1) / 2)
    Ho = (H + 2 * pad - K) // stride + 1
    Wo = (W + 2 * pad - K) // stride + 1
    M = Ho * Wo
    Mtot = N * M
    Kdim = K * K * Cin

    d_tm, d_tn, d_tkmax = _pick_tile_defaults()
    tm = d_tm if tm is None else tm
    tn = d_tn if tn is None else tn
    tk_max = d_tkmax if tk_max is None else tk_max

    # ----------------- wrapper-side layout plumbing (pure XLA) -----------------
    # Cast to compute dtype BEFORE im2col so the materialized patch tensor in
    # HBM is bf16 (halves the dominant HBM traffic).
    x_nhwc = jnp.transpose(x_nchw, (0, 2, 3, 1)).astype(compute_dtype)
    x_pad = jnp.pad(x_nhwc, ((0, 0), (pad, pad), (pad, pad), (0, 0)))
    taps = []
    for kh in range(K):
        for kw in range(K):
            taps.append(
                x_pad[:, kh:kh + (Ho - 1) * stride + 1:stride,
                      kw:kw + (Wo - 1) * stride + 1:stride, :])
    # (N, Ho, Wo, K*K, Cin) -> (N*M, Kdim); row ordering (kh, kw, cin).
    patches = jnp.stack(taps, axis=3).reshape(Mtot, Kdim)

    # Weight (Cout, Cin, K, K) -> (K, K, Cin, Cout) -> (Kdim, Cout).
    w2d = jnp.transpose(weight, (2, 3, 1, 0)).reshape(Kdim, Cout)

    # ----------------------------- tiling choices ------------------------------
    # bf16 packs 2 rows / sublane -> align the row tile to 16.
    tm = max(16, min(tm, _round_up(Mtot, 16)))
    tn = min(tn, _round_up(Cout, 128))       # lane-dense output tile

    # Contraction tile: multiple of 128 minimizing total padding of Kdim.
    Kp0 = _round_up(Kdim, 128)
    if Kp0 <= tk_max:
        TK = Kp0
    else:
        best_tk, best_pad = 128, _round_up(Kp0, 128)
        for cand in range(256, tk_max + 1, 128):
            padded = _round_up(Kp0, cand)
            if padded <= best_pad:
                best_tk, best_pad = cand, padded
        TK = best_tk
    Kp = _round_up(Kp0, TK)

    Mp = _round_up(Mtot, tm)
    Coutp = _round_up(Cout, tn)

    bytes_cd = jnp.dtype(compute_dtype).itemsize
    # Keep weights VMEM-resident across the whole reduction when they fit.
    resident_w = (2 * Kp * tn * bytes_cd) <= (16 * 1024 * 1024)

    patches_p = jnp.pad(patches, ((0, Mp - Mtot), (0, Kp - Kdim)))
    w_p = jnp.pad(w2d, ((0, Kp - Kdim), (0, Coutp - Cout))).astype(compute_dtype)
    b_p = jnp.pad(bias, (0, Coutp - Cout)).reshape(1, Coutp).astype(jnp.float32)

    grid = (Mp // tm, Coutp // tn, Kp // TK)

    if resident_w:
        w_spec = pl.BlockSpec((Kp, tn), lambda m, j, k: (0, j))
    else:
        w_spec = pl.BlockSpec((TK, tn), lambda m, j, k: (k, j))

    # VMEM budget derived from the actual (double-buffered) working set; kept
    # under v7x's 64 MiB physical VMEM.
    w_block_bytes = (Kp if resident_w else TK) * tn * bytes_cd
    working_set = (2 * tm * TK * bytes_cd     # patches (double-buffered)
                   + 2 * w_block_bytes        # weights
                   + 2 * tn * 4               # bias
                   + 2 * tm * tn * 4)         # f32 output block
    vmem_limit = int(min(60 * 1024 * 1024,
                         max(2 * working_set, 16 * 1024 * 1024)))

    kernel = functools.partial(_conv_gemm_kernel, tk=TK, resident_w=resident_w)

    out_padded = pl.pallas_call(
        kernel,
        out_shape=jax.ShapeDtypeStruct((Mp, Coutp), jnp.float32),
        grid_spec=pltpu.PrefetchScalarGridSpec(
            num_scalar_prefetch=0,
            grid=grid,
            in_specs=[
                pl.BlockSpec((tm, TK), lambda m, j, k: (m, k)),
                w_spec,
                pl.BlockSpec((1, tn), lambda m, j, k: (0, j)),
            ],
            out_specs=pl.BlockSpec((tm, tn), lambda m, j, k: (m, j)),
        ),
        compiler_params=pltpu.CompilerParams(
            dimension_semantics=("parallel", "parallel", "arbitrary"),
            vmem_limit_bytes=vmem_limit,
        ),
    )(patches_p, w_p, b_p)

    out = out_padded[:Mtot, :Cout].reshape(N, Ho, Wo, Cout)
    return jnp.transpose(out, (0, 3, 1, 2)).astype(x_nchw.dtype)  # NHWC -> NCHW


def _reference(x, weight, bias, stride, kSize):
    nOut = weight.shape[0]
    return jax.lax.conv_general_dilated(
        x, weight, window_strides=(stride, stride),
        padding=[((kSize - 1) // 2,) * 2] * 2,
        dimension_numbers=("NCHW", "OIHW", "NCHW"),
    ) + bias.reshape(1, nOut, 1, 1)


if __name__ == "__main__":
    # Module config: Conv(nIn=4, nOut=8, kSize=3, stride=1) (and stride=2).
    nIn, nOut, kSize = 4, 8, 3
    N, H, W = 2, 16, 16

    key = jax.random.PRNGKey(0)
    kx, kw, kb = jax.random.split(key, 3)

    x = jax.random.normal(kx, (N, nIn, H, W), dtype=jnp.float32)
    # Deterministic init mimicking PyTorch uniform(-1/sqrt(fan_in), +1/sqrt(fan_in)).
    fan_in = nIn * kSize * kSize
    bound = 1.0 / (fan_in ** 0.5)
    weight = jax.random.uniform(kw, (nOut, nIn, kSize, kSize),
                                minval=-bound, maxval=bound, dtype=jnp.float32)
    bias = jax.random.uniform(kb, (nOut,), minval=-bound, maxval=bound,
                              dtype=jnp.float32)

    ok = True
    for stride in (1, 2):
        out = conv_forward(x, weight, bias, stride=stride)
        out = jax.block_until_ready(out)
        ref = _reference(x, weight, bias, stride, kSize)
        assert out.shape == ref.shape, (out.shape, ref.shape)
        # bf16 MXU operands + f32 accumulation -> tolerance for bf16 rounding.
        ok = ok and bool(jnp.allclose(out, ref, atol=3e-2, rtol=3e-2))

    assert ok
    print("KERNEL_OK")
</pallas_src>

<mosaic_0001>
module attributes {stable_mosaic.version = 11 : i64} {
  func.func @_conv_gemm_kernel(%arg0: i32, %arg1: i32, %arg2: i32, %arg3: memref<256x128xbf16, #tpu.memory_space<vmem>>, %arg4: memref<128x128xbf16, #tpu.memory_space<vmem>>, %arg5: memref<1x128xf32, #tpu.memory_space<vmem>>, %arg6: memref<256x128xf32, #tpu.memory_space<vmem>>) attributes {dimension_semantics = [#tpu.dimension_semantics<parallel>, #tpu.dimension_semantics<parallel>, #tpu.dimension_semantics<arbitrary>], iteration_bounds = array<i64: 2, 1, 1>, scalar_prefetch = 0 : i64, scratch_operands = 0 : i64, tpu.core_type = #tpu.core_type<tc>, window_params = [{transform_indices = @transform_0, window_bounds = array<i64: 256, 128>}, {transform_indices = @transform_1, window_bounds = array<i64: 128, 128>}, {transform_indices = @transform_2, window_bounds = array<i64: 1, 128>}, {transform_indices = @transform_3, window_bounds = array<i64: 256, 128>}]} {
    %c128_i32 = arith.constant 128 : i32
    %0 = arith.muli %arg2, %c128_i32 : i32
    %1 = tpu.assume_multiple %0, 128 : i32
    %2 = arith.index_cast %1 : i32 to index
    %c0 = arith.constant 0 : index
    %3 = vector.load %arg4[%2, %c0] : memref<128x128xbf16, #tpu.memory_space<vmem>>, vector<128x128xbf16>
    %c0_0 = arith.constant 0 : index
    %c0_1 = arith.constant 0 : index
    %4 = vector.load %arg3[%c0_0, %c0_1] : memref<256x128xbf16, #tpu.memory_space<vmem>>, vector<256x128xbf16>
    %cst = arith.constant dense<0.000000e+00> : vector<256x128xf32>
    %5 = tpu.matmul %4, %3, %cst {dimension_numbers = #tpu.dot_dimension_numbers<[1], [0], [0], [1], [0, 0, 1, 1], [], []>} : vector<256x128xbf16>, vector<128x128xbf16>, vector<256x128xf32> -> vector<256x128xf32>
    %c0_i32 = arith.constant 0 : i32
    %6 = arith.cmpi eq, %arg2, %c0_i32 : i32
    %7 = arith.extui %6 : i1 to i32
    %c0_i32_2 = arith.constant 0 : i32
    %8 = arith.cmpi ne, %7, %c0_i32_2 : i32
    scf.if %8 {
      %c0_5 = arith.constant 0 : index
      %c0_6 = arith.constant 0 : index
      %12 = vector.load %arg5[%c0_5, %c0_6] : memref<1x128xf32, #tpu.memory_space<vmem>>, vector<1x128xf32>
      %13 = vector.broadcast %12 : vector<1x128xf32> to vector<256x128xf32>
      %14 = arith.addf %13, %5 : vector<256x128xf32>
      %c0_7 = arith.constant 0 : index
      %c0_8 = arith.constant 0 : index
      %15 = vector.load %arg6[%c0_7, %c0_8] : memref<256x128xf32, #tpu.memory_space<vmem>>, vector<256x128xf32>
      tpu.vector_store %arg6[%c0_7, %c0_8], %14 {strides = array<i32>} : memref<256x128xf32, #tpu.memory_space<vmem>>, vector<256x128xf32>,
    } else {
    }
    %c0_i32_3 = arith.constant 0 : i32
    %9 = arith.cmpi sgt, %arg2, %c0_i32_3 : i32
    %10 = arith.extui %9 : i1 to i32
    %c0_i32_4 = arith.constant 0 : i32
    %11 = arith.cmpi ne, %10, %c0_i32_4 : i32
    scf.if %11 {
      %c0_5 = arith.constant 0 : index
      %c0_6 = arith.constant 0 : index
      %12 = vector.load %arg6[%c0_5, %c0_6] : memref<256x128xf32, #tpu.memory_space<vmem>>, vector<256x128xf32>
      %13 = arith.addf %12, %5 : vector<256x128xf32>
      %c0_7 = arith.constant 0 : index
      %c0_8 = arith.constant 0 : index
      %14 = vector.load %arg6[%c0_7, %c0_8] : memref<256x128xf32, #tpu.memory_space<vmem>>, vector<256x128xf32>
      tpu.vector_store %arg6[%c0_7, %c0_8], %13 {strides = array<i32>} : memref<256x128xf32, #tpu.memory_space<vmem>>, vector<256x128xf32>,
    } else {
    }
    return
  }
  func.func @transform_0(%arg0: i32, %arg1: i32, %arg2: i32) -> (i32, i32) {
    %c0_i32 = arith.constant 0 : i32
    return %arg0, %arg2 : i32, i32
  }
  func.func @transform_1(%arg0: i32, %arg1: i32, %arg2: i32) -> (i32, i32) {
    %c0_i32 = arith.constant 0 : i32
    %c0_i32_0 = arith.constant 0 : i32
    return %c0_i32, %arg1 : i32, i32
  }
  func.func @transform_2(%arg0: i32, %arg1: i32, %arg2: i32) -> (i32, i32) {
    %c0_i32 = arith.constant 0 : i32
    %c0_i32_0 = arith.constant 0 : i32
    return %c0_i32, %arg1 : i32, i32
  }
  func.func @transform_3(%arg0: i32, %arg1: i32, %arg2: i32) -> (i32, i32) {
    %c0_i32 = arith.constant 0 : i32
    return %arg0, %arg1 : i32, i32
  }
}

</mosaic_0001>

<bundles_post_ra>
// kernel: conv_forward.1
= control target key start
LH: loop header
LB: loop body
LE: loop exit
PB: predicated region body
PF: predicated region fallthrough
CT: control target
= control target key end

     0   :  { %s1105_s12 = smov 0   ;;  %s1107_s13 = smov 0   ;;  %s1255_s0 = inlined_call_operand.vmem [shape: bf16[512,128], index: 0, kind: input, shape index: {}]   ;;  %s1256_s1 = inlined_call_operand.vmem [shape: bf16[128,128], index: 1, kind: input, shape index: {}]   ;;  %s1257_s2 = inlined_call_operand.vmem [shape: f32[1,128], index: 2, kind: input, shape index: {}]   ;;  %s1258_s3 = inlined_call_operand.vmem [shape: f32[512,128], index: 3, kind: output, shape index: {}]  }
   0x1   :  { %s1109_s14 = smov 0  }
   0x2 LB: > { %s32_s15 = sadd.s32 1, %s1079_s13  ;;  %p893_p0 = scmp.ge.s32.totalorder %s1083_s14, 1  ;;  %s1083_s14 = sphi %s1109_s14, %s13_s14   ;;  %s1079_s13 = sphi %s1107_s13, %s1260_s13   ;;  %s1075_s12 = sphi %s1105_s12, %s1259_s12  }
   0x3   : > { %p34_p1 = scmp.ge.s32.totalorder %s32_s15, 2  ;;  %p181_p2 = scmp.lt.s32.totalorder %s1083_s14, 3 }
   0x5   : > { %s1262_s15 = smov (%p34_p1, %s32_s15), 0  ;;  %p182_p3 = pnand %p893_p0, %p181_p2 }
   0x6   : > { %s894_s18 = sshll.u32 (!%p182_p3), %s1075_s12, 5 }
   0x7   : > { %185 = sbr.rel (%p182_p3) target bundleno = 271 (0x10f), region = 32  ;;  %p219_p4 = scmp.lt.s32.totalorder (!%p182_p3), %s894_s18, 63 }
   0xc   : > { %v1037_v0 = vld [vmem:[%s1256_s1 + $0x38] sm:$0xff]   ;;  %v1038_v1 = vld [vmem:[%s1256_s1 + $0x30] sm:$0xff]   ;;  %s1264_s18 = smov (!%p219_p4, %s894_s18), 63  ;;  %v1039_v2 = vld [vmem:[%s1256_s1 + $0x28] sm:$0xff]  }
   0xd   : > { %949 = vmatprep.subr.bf16.mxu0 %v1037_v0  ;;  %997 = vmatprep.subr.bf16.mxu1 %v1037_v0  ;;  %s895_s23 = sshll.u32 %s1264_s18, 2  ;;  %v1040_v3 = vld [vmem:[%s1256_s1 + $0x20] sm:$0xff]   ;;  %v1041_v6 = vld [vmem:[%s1256_s1 + $0x18] sm:$0xff]   ;;  %v1042_v7 = vld [vmem:[%s1256_s1 + $0x10] sm:$0xff]   ;;  %s897_s10 = sshll.u32 %s1264_s18, 3 }
   0xe   : > { %950 = vmatpush3.bf16.msra.mxu0 %v1037_v0  ;;  %1005 = vmatpush3.bf16.msra.mxu1 %v1037_v0  ;;  %s1138_s26 = scalar_lea.vmem %s1255_s0, %s895_s23  ;;  %v1043_v8 = vld [vmem:[%s1256_s1 + $0x8] sm:$0xff]   ;;  %v1044_v9 = vld [vmem:[%s1256_s1] sm:$0xff]   ;;  %s1180_s19 = scalar_lea.vmem %s1258_s3, %s897_s10 }
   0xf   : > { %951 = vmatprep.subr.bf16.mxu0 %v1038_v1  ;;  %998 = vmatprep.subr.bf16.mxu1 %v1038_v1  ;;  %v1045_v4 = vld [vmem:[%s1138_s26] sm:$0xff]   ;;  %v1047_v10 = vld [vmem:[%s1138_s26 + $0x8] sm:$0xff]   ;;  %v1049_v12 = vld [vmem:[%s1138_s26 + $0x10] sm:$0xff]  }
  0x10   : > { %v1046_v5 = vld [vmem:[%s1138_s26 + $0x40] sm:$0xff]   ;;  %965 = vmatprep.mubr.bf16.mxu0 %v1045_v4  ;;  %v1048_v11 = vld [vmem:[%s1138_s26 + $0x48] sm:$0xff]   ;;  %v1050_v13 = vld [vmem:[%s1138_s26 + $0x50] sm:$0xff]  }
  0x11   : > { %981 = vmatprep.mubr.bf16.mxu1 %v1046_v5  ;;  %v1051_v14 = vld [vmem:[%s1138_s26 + $0x18] sm:$0xff]   ;;  %v1053_v16 = vld [vmem:[%s1138_s26 + $0x20] sm:$0xff]   ;;  %v1055_v18 = vld [vmem:[%s1138_s26 + $0x28] sm:$0xff]  }
  0x12   : > { %952 = vmatpush3.bf16.msra.mxu0 %v1038_v1  ;;  %1006 = vmatpush3.bf16.msra.mxu1 %v1038_v1  ;;  %v1052_v15 = vld [vmem:[%s1138_s26 + $0x58] sm:$0xff]   ;;  %v1054_v17 = vld [vmem:[%s1138_s26 + $0x60] sm:$0xff]   ;;  %v1056_v19 = vld [vmem:[%s1138_s26 + $0x68] sm:$0xff]  }
  0x13   : > { %953 = vmatprep.subr.bf16.mxu0 %v1039_v2  ;;  %999 = vmatprep.subr.bf16.mxu1 %v1039_v2  ;;  %v1057_v20 = vld [vmem:[%s1138_s26 + $0x30] sm:$0xff]   ;;  %v1059_v22 = vld [vmem:[%s1138_s26 + $0x38] sm:$0xff]   ;;  %v1175_v24 = vld [vmem:[%s1257_s2] ss:$0 sm:$0xff] }
  0x14   : > { %v1058_v21 = vld [vmem:[%s1138_s26 + $0x70] sm:$0xff]   ;;  %v1060_v23 = vld [vmem:[%s1138_s26 + $0x78] sm:$0xff]  }
  0x16   : > { %954 = vmatpush3.bf16.msra.mxu0 %v1039_v2  ;;  %1007 = vmatpush3.bf16.msra.mxu1 %v1039_v2 }
  0x17   : > { %955 = vmatprep.subr.bf16.mxu0 %v1040_v3  ;;  %1000 = vmatprep.subr.bf16.mxu1 %v1040_v3 }
  0x1a   : > { %956 = vmatpush3.bf16.msra.mxu0 %v1040_v3  ;;  %1008 = vmatpush3.bf16.msra.mxu1 %v1040_v3 }
  0x1b   : > { %957 = vmatprep.subr.bf16.mxu0 %v1041_v6  ;;  %1001 = vmatprep.subr.bf16.mxu1 %v1041_v6 }
  0x1e   : > { %958 = vmatpush3.bf16.msra.mxu0 %v1041_v6  ;;  %1009 = vmatpush3.bf16.msra.mxu1 %v1041_v6 }
  0x1f   : > { %959 = vmatprep.subr.bf16.mxu0 %v1042_v7  ;;  %1002 = vmatprep.subr.bf16.mxu1 %v1042_v7 }
  0x22   : > { %960 = vmatpush3.bf16.msra.mxu0 %v1042_v7  ;;  %1010 = vmatpush3.bf16.msra.mxu1 %v1042_v7 }
  0x23   : > { %961 = vmatprep.subr.bf16.mxu0 %v1043_v8  ;;  %1003 = vmatprep.subr.bf16.mxu1 %v1043_v8 }
  0x26   : > { %962 = vmatpush3.bf16.msra.mxu0 %v1043_v8  ;;  %1011 = vmatpush3.bf16.msra.mxu1 %v1043_v8 }
  0x27   : > { %963 = vmatprep.subr.bf16.mxu0 %v1044_v9  ;;  %1004 = vmatprep.subr.bf16.mxu1 %v1044_v9 }
  0x2a   : > { %964 = vmatpush3.bf16.msra.mxu0 %v1044_v9  ;;  %1012 = vmatpush3.bf16.msra.mxu1 %v1044_v9 }
  0x2d   : > { %966 = vmatmul.mubr.bf16.vlgmr.msra.gmra.mxu0 %v1047_v10  ;;  %982 = vmatmul.mubr.bf16.vlgmr.msra.gmra.mxu1 %v1048_v11 }
  0x2e   : > { %969 = vmatprep.mubr.bf16.mxu0 %v1049_v12  ;;  %985 = vmatprep.mubr.bf16.mxu1 %v1050_v13 }
  0x35   : > { %970 = vmatmul.mubr.bf16.gmra.mxu0 %v1051_v14  ;;  %986 = vmatmul.mubr.bf16.gmra.mxu1 %v1052_v15 }
  0x36   : > { %973 = vmatprep.mubr.bf16.mxu0 %v1053_v16  ;;  %989 = vmatprep.mubr.bf16.mxu1 %v1054_v17 }
  0x3d   : > { %974 = vmatmul.mubr.bf16.gmra.mxu0 %v1055_v18  ;;  %990 = vmatmul.mubr.bf16.gmra.mxu1 %v1056_v19 }
  0x3e   : > { %977 = vmatprep.mubr.bf16.mxu0 %v1057_v20  ;;  %993 = vmatprep.mubr.bf16.mxu1 %v1058_v21 }
  0x45   : > { %978 = vmatmul.mubr.bf16.gmra.mxu0 %v1059_v22  ;;  %994 = vmatmul.mubr.bf16.gmra.mxu1 %v1060_v23 }
  0xed   : > { %v967_v25 = vpop.f32.mrf.mxu0  ;;  %v983_v26 = vpop.f32.mrf.mxu1 }
  0xee   : > { %v615_v27 = vadd.f32 %v967_v25, %v1175_v24  ;;  %v631_v28 = vadd.f32 %v983_v26, %v1175_v24 }
  0xef   : > { %v475_v29 = vpop.f32.mrf.mxu0  ;;  %v539_v30 = vpop.f32.mrf.mxu1 }
  0xf0   : > { %647 = vst [vmem:[%s1180_s19 + $0x10] sm:$0xff] %v615_v27  ;;  %663 = vst [vmem:[%s1180_s19 + $0x90] sm:$0xff] %v631_v28  ;;  %v613_v31 = vadd.f32 %v1175_v24, %v475_v29  ;;  %v629_v32 = vadd.f32 %v1175_v24, %v539_v30 }
  0xf1   : > { %v968_v33 = vpop.f32.mrf.mxu0  ;;  %v984_v34 = vpop.f32.mrf.mxu1 }
  0xf2   : > { %645 = vst [vmem:[%s1180_s19] sm:$0xff] %v613_v31  ;;  %661 = vst [vmem:[%s1180_s19 + $0x80] sm:$0xff] %v629_v32  ;;  %v616_v35 = vadd.f32 %v968_v33, %v1175_v24  ;;  %v632_v36 = vadd.f32 %v984_v34, %v1175_v24 }
  0xf3   : > { %v478_v37 = vpop.f32.mrf.mxu0  ;;  %v542_v38 = vpop.f32.mrf.mxu1 }
  0xf4   : > { %648 = vst [vmem:[%s1180_s19 + $0x18] sm:$0xff] %v616_v35  ;;  %664 = vst [vmem:[%s1180_s19 + $0x98] sm:$0xff] %v632_v36  ;;  %v614_v39 = vadd.f32 %v1175_v24, %v478_v37  ;;  %v630_v40 = vadd.f32 %v1175_v24, %v542_v38 }
  0xf5   : > { %v971_v41 = vpop.f32.mrf.mxu0  ;;  %v987_v42 = vpop.f32.mrf.mxu1 }
  0xf6   : > { %646 = vst [vmem:[%s1180_s19 + $0x8] sm:$0xff] %v614_v39  ;;  %662 = vst [vmem:[%s1180_s19 + $0x88] sm:$0xff] %v630_v40  ;;  %v619_v43 = vadd.f32 %v971_v41, %v1175_v24  ;;  %v635_v44 = vadd.f32 %v987_v42, %v1175_v24 }
  0xf7   : > { %v491_v45 = vpop.f32.mrf.mxu0  ;;  %v555_v46 = vpop.f32.mrf.mxu1 }
  0xf8   : > { %651 = vst [vmem:[%s1180_s19 + $0x30] sm:$0xff] %v619_v43  ;;  %667 = vst [vmem:[%s1180_s19 + $0xb0] sm:$0xff] %v635_v44  ;;  %v617_v47 = vadd.f32 %v1175_v24, %v491_v45  ;;  %v633_v48 = vadd.f32 %v1175_v24, %v555_v46 }
  0xf9   : > { %v972_v49 = vpop.f32.mrf.mxu0  ;;  %v988_v50 = vpop.f32.mrf.mxu1 }
  0xfa   : > { %649 = vst [vmem:[%s1180_s19 + $0x20] sm:$0xff] %v617_v47  ;;  %665 = vst [vmem:[%s1180_s19 + $0xa0] sm:$0xff] %v633_v48  ;;  %v620_v51 = vadd.f32 %v972_v49, %v1175_v24  ;;  %v636_v52 = vadd.f32 %v988_v50, %v1175_v24 }
  0xfb   : > { %v494_v53 = vpop.f32.mrf.mxu0  ;;  %v558_v54 = vpop.f32.mrf.mxu1 }
  0xfc   : > { %652 = vst [vmem:[%s1180_s19 + $0x38] sm:$0xff] %v620_v51  ;;  %668 = vst [vmem:[%s1180_s19 + $0xb8] sm:$0xff] %v636_v52  ;;  %v618_v55 = vadd.f32 %v1175_v24, %v494_v53  ;;  %v634_v56 = vadd.f32 %v1175_v24, %v558_v54 }
  0xfd   : > { %v975_v57 = vpop.f32.mrf.mxu0  ;;  %v991_v58 = vpop.f32.mrf.mxu1 }
  0xfe   : > { %650 = vst [vmem:[%s1180_s19 + $0x28] sm:$0xff] %v618_v55  ;;  %666 = vst [vmem:[%s1180_s19 + $0xa8] sm:$0xff] %v634_v56  ;;  %v623_v59 = vadd.f32 %v975_v57, %v1175_v24  ;;  %v639_v60 = vadd.f32 %v991_v58, %v1175_v24 }
  0xff   : > { %v507_v61 = vpop.f32.mrf.mxu0  ;;  %v571_v62 = vpop.f32.mrf.mxu1 }
 0x100   : > { %655 = vst [vmem:[%s1180_s19 + $0x50] sm:$0xff] %v623_v59  ;;  %671 = vst [vmem:[%s1180_s19 + $0xd0] sm:$0xff] %v639_v60  ;;  %v621_v63 = vadd.f32 %v1175_v24, %v507_v61  ;;  %v637_v0 = vadd.f32 %v1175_v24, %v571_v62 }
 0x101   : > { %v976_v1 = vpop.f32.mrf.mxu0  ;;  %v992_v2 = vpop.f32.mrf.mxu1 }
 0x102   : > { %653 = vst [vmem:[%s1180_s19 + $0x40] sm:$0xff] %v621_v63  ;;  %669 = vst [vmem:[%s1180_s19 + $0xc0] sm:$0xff] %v637_v0  ;;  %v624_v3 = vadd.f32 %v976_v1, %v1175_v24  ;;  %v640_v4 = vadd.f32 %v992_v2, %v1175_v24 }
 0x103   : > { %v510_v5 = vpop.f32.mrf.mxu0  ;;  %v574_v6 = vpop.f32.mrf.mxu1 }
 0x104   : > { %656 = vst [vmem:[%s1180_s19 + $0x58] sm:$0xff] %v624_v3  ;;  %672 = vst [vmem:[%s1180_s19 + $0xd8] sm:$0xff] %v640_v4  ;;  %v622_v7 = vadd.f32 %v1175_v24, %v510_v5  ;;  %v638_v8 = vadd.f32 %v1175_v24, %v574_v6 }
 0x105   : > { %v979_v9 = vpop.f32.mrf.mxu0  ;;  %v995_v10 = vpop.f32.mrf.mxu1 }
 0x106   : > { %654 = vst [vmem:[%s1180_s19 + $0x48] sm:$0xff] %v622_v7  ;;  %670 = vst [vmem:[%s1180_s19 + $0xc8] sm:$0xff] %v638_v8  ;;  %v627_v11 = vadd.f32 %v979_v9, %v1175_v24  ;;  %v643_v12 = vadd.f32 %v995_v10, %v1175_v24 }
 0x107   : > { %v523_v13 = vpop.f32.mrf.mxu0  ;;  %v587_v14 = vpop.f32.mrf.mxu1 }
 0x108   : > { %659 = vst [vmem:[%s1180_s19 + $0x70] sm:$0xff] %v627_v11  ;;  %675 = vst [vmem:[%s1180_s19 + $0xf0] sm:$0xff] %v643_v12  ;;  %v625_v15 = vadd.f32 %v1175_v24, %v523_v13  ;;  %v641_v16 = vadd.f32 %v1175_v24, %v587_v14 }
 0x109   : > { %v980_v17 = vpop.f32.mrf.mxu0  ;;  %v996_v18 = vpop.f32.mrf.mxu1 }
 0x10a   : > { %657 = vst [vmem:[%s1180_s19 + $0x60] sm:$0xff] %v625_v15  ;;  %673 = vst [vmem:[%s1180_s19 + $0xe0] sm:$0xff] %v641_v16  ;;  %v628_v19 = vadd.f32 %v980_v17, %v1175_v24  ;;  %v644_v20 = vadd.f32 %v996_v18, %v1175_v24 }
 0x10b   : > { %v526_v21 = vpop.f32.mrf.mxu0  ;;  %v590_v22 = vpop.f32.mrf.mxu1 }
 0x10c   : > { %660 = vst [vmem:[%s1180_s19 + $0x78] sm:$0xff] %v628_v19  ;;  %676 = vst [vmem:[%s1180_s19 + $0xf8] sm:$0xff] %v644_v20  ;;  %v626_v23 = vadd.f32 %v1175_v24, %v526_v21  ;;  %v642_v25 = vadd.f32 %v1175_v24, %v590_v22 }
 0x10e   : > { %658 = vst [vmem:[%s1180_s19 + $0x68] sm:$0xff] %v626_v23  ;;  %674 = vst [vmem:[%s1180_s19 + $0xe8] sm:$0xff] %v642_v25 }
 0x10f PF: > { %s13_s14 = sadd.s32 1, %s1083_s14   ;;  %s1259_s12 = smov %s1079_s13 }
 0x110   : > { %p10_p5 = scmp.ge.s32.totalorder %s13_s14, 4   ;;  %s1260_s13 = smov %s1262_s15 }
 0x112   :  { %12 = sbr.rel (!%p10_p5) target bundleno = 2 (0x2), region = 77 }

</bundles_post_ra>
